<compile_context>
chip_gen: v6e
topology: v6e:2x2x1
jax: 0.10.0
libtpu: 0.0.40
codegen_flags: <defaults>
</compile_context>

<pallas_src>
import jax
import jax.numpy as jnp
from jax.experimental import pallas as pl
from jax.experimental.pallas import tpu as pltpu


# ---------------------------------------------------------------------------
# Kernels: pure elementwise, math stays in the activation dtype.
# ---------------------------------------------------------------------------
def _drop_path_kernel(scale_ref, x_ref, o_ref):
    # scale_ref: (TB, 1) in x.dtype, values in {0, 1/keep_prob}
    # x_ref / o_ref: (TB, TCOL) tiles
    o_ref[...] = x_ref[...] * scale_ref[...]


def _drop_path_residual_kernel(scale_ref, x_ref, res_ref, o_ref):
    # Fused residual add: o = residual + x * scale
    o_ref[...] = res_ref[...] + x_ref[...] * scale_ref[...]


# ---------------------------------------------------------------------------
# Per-generation VMEM capacity (fallback: 64 MiB = v7x per-TC, most conservative).
# ---------------------------------------------------------------------------
def _vmem_capacity_bytes():
    try:
        info = pltpu.get_tpu_info()
        cap = getattr(info, "vmem_capacity_bytes", None)
        if cap:
            return int(cap)
    except Exception:
        pass
    return 64 << 20


def _round_down(x, m):
    return (x // m) * m


# ---------------------------------------------------------------------------
# Tiling: lane-dense, 128-aligned column tiles via cdiv (masked ragged edges),
# whole block capped at ~target_bytes.  Block dims are either full array dims
# or (row_align, 128)-aligned, so every shape is legal.
# ---------------------------------------------------------------------------
def _choose_tiles(B, NC, itemsize, target_bytes, row_align):
    # Column tile: full NC if it fits the budget with row_align rows, else the
    # largest multiple of 128 that does (cdiv handles the ragged edge block).
    max_cols = max(128, _round_down(target_bytes // (row_align * itemsize), 128))
    tcol = NC if NC <= max_cols else max_cols

    # Row tile: spend the remaining budget on rows (multiple of row_align or full B).
    row_bytes = max(1, tcol * itemsize)
    rows_fit = max(row_align, _round_down(int(target_bytes // row_bytes), row_align))
    tb = B if rows_fit >= B else rows_fit
    return tb, tcol


def _nblocks(B, NC, tb, tcol):
    return pl.cdiv(B, tb) * pl.cdiv(NC, tcol)


def _maybe_split_for_megacore(B, NC, tb, tcol, itemsize, row_align, min_blocks=4):
    # For multi-MiB tensors make sure the grid has enough blocks that
    # dimension_semantics=("parallel","parallel") can shard across 2 TCs (v7x).
    total_bytes = B * NC * itemsize
    if total_bytes < (4 << 20) or _nblocks(B, NC, tb, tcol) >= min_blocks:
        return tb, tcol
    if NC >= min_blocks * 128:
        tcol = max(128, _round_down(NC // min_blocks, 128))
    if _nblocks(B, NC, tb, tcol) < min_blocks and B >= min_blocks * row_align:
        tb = max(row_align, _round_down(B // min_blocks, row_align))
    return tb, tcol


# ---------------------------------------------------------------------------
# Wrapper
# ---------------------------------------------------------------------------
def drop_path(x, drop_prob, training, key, residual=None, block_target_bytes=None):
    """Pallas stochastic-depth forward. Optionally fuses `residual + out`."""
    if drop_prob is None or drop_prob == 0.0 or not training:
        return x if residual is None else x + residual

    keep_prob = 1.0 - float(drop_prob)
    orig_shape = x.shape
    B = orig_shape[0]
    NC = 1
    for d in orig_shape[1:]:
        NC *= d

    # Per-sample keep mask (host-side RNG glue), keep_prob pre-folded, already in
    # the activation dtype so the kernel multiply never promotes.
    # TODO(synk): keep the scale in f32 if this is ever reused for fp8 activations.
    u = jax.random.uniform(key, (B,), dtype=jnp.float32)
    mask = jnp.floor(keep_prob + u)
    scale = (mask / keep_prob).astype(x.dtype).reshape(B, 1)

    itemsize = jnp.dtype(x.dtype).itemsize
    row_align = max(8, 32 // max(1, itemsize))       # native sublane rows per dtype

    target_bytes = int(block_target_bytes) if block_target_bytes else (4 << 20)
    tb, tcol = _choose_tiles(B, NC, itemsize, target_bytes, row_align)
    tb, tcol = _maybe_split_for_megacore(B, NC, tb, tcol, itemsize, row_align)

    grid = (pl.cdiv(B, tb), pl.cdiv(NC, tcol))

    # Scoped-VMEM budget derived from the actual tiles: big streams are
    # double-buffered, scale is lane-padded to 128, plus slack.
    block_bytes = tb * tcol * itemsize
    n_big = 2 if residual is None else 3             # x (+ residual) + out
    footprint = n_big * 2 * block_bytes + 2 * tb * 128 * itemsize + (2 << 20)
    vmem_cap = _vmem_capacity_bytes()
    vmem_limit = int(min(max(footprint, 16 << 20), vmem_cap - (4 << 20)))

    x2 = x.reshape(B, NC)
    scale_spec = pl.BlockSpec((tb, 1), lambda i, j: (i, 0))
    xo_spec = pl.BlockSpec((tb, tcol), lambda i, j: (i, j))

    if residual is None:
        kernel = _drop_path_kernel
        in_specs = [scale_spec, xo_spec]
        operands = (scale, x2)
    else:
        kernel = _drop_path_residual_kernel
        in_specs = [scale_spec, xo_spec, xo_spec]
        operands = (scale, x2, residual.reshape(B, NC))

    out = pl.pallas_call(
        kernel,
        out_shape=jax.ShapeDtypeStruct((B, NC), x.dtype),
        grid=grid,
        in_specs=in_specs,
        out_specs=xo_spec,
        compiler_params=pltpu.CompilerParams(
            dimension_semantics=("parallel", "parallel"),
            vmem_limit_bytes=vmem_limit),
    )(*operands)
    return out.reshape(orig_shape)


class DropPath:
    """Drop paths (Stochastic Depth) per sample (main path of residual blocks)."""

    def __init__(self, drop_prob=None):
        self.drop_prob = drop_prob
        self.training = True  # mirror nn.Module default training mode

    def __call__(self, x, key, residual=None):
        return drop_path(x, self.drop_prob, self.training, key, residual)

    def extra_repr(self) -> str:
        return 'p={}'.format(self.drop_prob)


# ---------------------------------------------------------------------------
# Self-test
# ---------------------------------------------------------------------------
if __name__ == "__main__":
    key = jax.random.PRNGKey(0)
    xkey, mkey, rkey, x2key, m2key, x3key, m3key = jax.random.split(key, 7)

    drop_prob = 0.25
    keep_prob = 1.0 - drop_prob

    def ref_drop_path(x, mask_key, residual=None):
        u = jax.random.uniform(mask_key, (x.shape[0],), dtype=jnp.float32)
        m = jnp.floor(keep_prob + u)
        s = (m / keep_prob).astype(x.dtype).reshape((-1,) + (1,) * (x.ndim - 1))
        out = x * s
        return out if residual is None else residual + out

    # --- small f32 token tensor (B, N, C) -------------------------------
    B, N, C = 2, 8, 128
    x = jax.random.normal(xkey, (B, N, C), dtype=jnp.float32)
    module = DropPath(drop_prob=drop_prob)

    out = jax.block_until_ready(module(x, mkey))
    ref = ref_drop_path(x, mkey)
    assert out.shape == x.shape and out.dtype == x.dtype
    assert jnp.allclose(out, ref, atol=1e-6), "f32 train-mode mismatch"

    # --- fused residual path ---------------------------------------------
    res = jax.random.normal(rkey, (B, N, C), dtype=jnp.float32)
    out_fused = jax.block_until_ready(module(x, mkey, residual=res))
    ref_fused = ref_drop_path(x, mkey, residual=res)
    assert jnp.allclose(out_fused, ref_fused, atol=1e-6), "fused residual mismatch"

    # --- bf16 activations -------------------------------------------------
    B2, N2, C2 = 8, 24, 256
    xb = jax.random.normal(x2key, (B2, N2, C2), dtype=jnp.bfloat16)
    out_b = jax.block_until_ready(module(xb, m2key))
    ref_b = ref_drop_path(xb, m2key)
    assert out_b.dtype == jnp.bfloat16
    assert jnp.allclose(out_b.astype(jnp.float32), ref_b.astype(jnp.float32),
                        atol=1e-2), "bf16 train-mode mismatch"

    # --- ragged tiling path: non-128-divisible NC, non-8-divisible B, tiny
    #     block target forces cdiv edge blocks on both grid axes ------------
    B3, N3, C3 = 10, 7, 96   # NC = 672 (= 5*128 + 32), B = 10 (= 8 + 2)
    xr = jax.random.normal(x3key, (B3, N3, C3), dtype=jnp.float32)
    out_r = jax.block_until_ready(
        drop_path(xr, drop_prob, True, m3key, block_target_bytes=4096))
    ref_r = ref_drop_path(xr, m3key)
    assert jnp.allclose(out_r, ref_r, atol=1e-6), "ragged-tile mismatch"

    # --- eval mode (identity) --------------------------------------------
    module.training = False
    out_eval = jax.block_until_ready(module(x, mkey))
    assert jnp.allclose(out_eval, x), "eval-mode should be identity"

    print("KERNEL_OK")
</pallas_src>

<mosaic_0001>
module attributes {stable_mosaic.version = 11 : i64} {
  func.func @_drop_path_kernel(%arg0: i32, %arg1: i32, %arg2: memref<2x1xf32, #tpu.memory_space<vmem>>, %arg3: memref<2x1024xf32, #tpu.memory_space<vmem>>, %arg4: memref<2x1024xf32, #tpu.memory_space<vmem>>) attributes {dimension_semantics = [#tpu.dimension_semantics<parallel>, #tpu.dimension_semantics<parallel>], iteration_bounds = array<i64: 1, 1>, scalar_prefetch = 0 : i64, scratch_operands = 0 : i64, tpu.core_type = #tpu.core_type<tc>, window_params = [{transform_indices = @transform_0, window_bounds = array<i64: 2, 1>}, {transform_indices = @transform_1, window_bounds = array<i64: 2, 1024>}, {transform_indices = @transform_2, window_bounds = array<i64: 2, 1024>}]} {
    %c0 = arith.constant 0 : index
    %c0_0 = arith.constant 0 : index
    %0 = vector.load %arg3[%c0, %c0_0] : memref<2x1024xf32, #tpu.memory_space<vmem>>, vector<2x1024xf32>
    %c0_1 = arith.constant 0 : index
    %c0_2 = arith.constant 0 : index
    %1 = vector.load %arg2[%c0_1, %c0_2] : memref<2x1xf32, #tpu.memory_space<vmem>>, vector<2x1xf32>
    %2 = vector.broadcast %1 : vector<2x1xf32> to vector<2x1024xf32>
    %3 = arith.mulf %0, %2 : vector<2x1024xf32>
    %c0_3 = arith.constant 0 : index
    %c0_4 = arith.constant 0 : index
    %4 = vector.load %arg4[%c0_3, %c0_4] : memref<2x1024xf32, #tpu.memory_space<vmem>>, vector<2x1024xf32>
    tpu.vector_store %arg4[%c0_3, %c0_4], %3 {strides = array<i32>} : memref<2x1024xf32, #tpu.memory_space<vmem>>, vector<2x1024xf32>,
    return
  }
  func.func @transform_0(%arg0: i32, %arg1: i32) -> (i32, i32) {
    %c0_i32 = arith.constant 0 : i32
    %c0_i32_0 = arith.constant 0 : i32
    return %arg0, %c0_i32 : i32, i32
  }
  func.func @transform_1(%arg0: i32, %arg1: i32) -> (i32, i32) {
    %c0_i32 = arith.constant 0 : i32
    return %arg0, %arg1 : i32, i32
  }
  func.func @transform_2(%arg0: i32, %arg1: i32) -> (i32, i32) {
    %c0_i32 = arith.constant 0 : i32
    return %arg0, %arg1 : i32, i32
  }
}

</mosaic_0001>

<bundles_post_ra>
// kernel: tpu_custom_call.1
= control target key start
LH: loop header
LB: loop body
LE: loop exit
PB: predicated region body
PF: predicated region fallthrough
CT: control target
= control target key end

     0   :  { %7 = vsyncpa [#allocation3], 0  ;;  %s135_s0 = inlined_call_operand.vmem [shape: f32[2,1], index: 0, kind: input, shape index: {}]   ;;  %s136_s1 = inlined_call_operand.hbm [shape: f32[2,1024], index: 1, kind: input, shape index: {}]   ;;  %s137_s2 = inlined_call_operand.hbm [shape: f32[2,1024], index: 2, kind: output, shape index: {}]  }
   0x1   :  { %8 = vsyncpa [#allocation4], 0  ;;  %s107_s9 = smov [#allocation2]  }
   0x2   :  { %s17_s10 = sshll.u32 %s107_s9, 4  ;;  %s18_s10 = int_to_ptr.vmem [resolvable:$true] %s17_s10 }
   0x3   :  { %s71_s11 = scalar_lea.vmem %s18_s10, 256  ;;  %p76_p1 = scmp.lt.s32.totalorder %s18_s10, %s18_s10 }
   0x4   :  { %p72_p0 = scmp.ne.s32.totalorder %s18_s10, %s71_s11  ;;  %p77_p2 = scmp.lt.s32.totalorder %s71_s11, %s71_s11 }
   0x6   :  { %p78_p3 = por %p77_p2, %p76_p1 }
   0x8   :  { %p79_p4 = pnand %p78_p3, %p72_p0 }
   0xa   :  { %82 = shalt.err (!%p79_p4)
}
   0xb   :  { %20 = dma.hbm_to_vmem [thread:$0]  %s136_s1, 256, %s18_s10, [#allocation3]  }
   0xc   :  { %103 = dma.done.wait [#allocation3], 256  }
   0xd   :  { %104 = vsyncadd [#allocation3], 4294967040  ;;  %v108_v0 = vmov 0   ;;  %v26_v1 = vld [vmem:[%s135_s0] sm:$0x3]  ;;  %v34_v4 = vlaneseq  ;;  %v25_v10 = vld [vmem:[#allocation2 + $0x8] sm:$0xff] }
   0xe   :  { %62 = vset.pattern.permute.xlu0 %v108_v0  ;;  %v109_v2 = vmov 269488144   ;;  %v24_v9 = vld [vmem:[#allocation2] sm:$0xff]  ;;  %s110_s16 = smov [#allocation5]  }
   0xf   :  { %29 = vperm.xlu0 %62, %v26_v1   ;;  %v32_v3 = vunpack.c.l.s4 %v109_v2  ;;  %v35_v6 = vshrl.u32 %v34_v4, 7  ;;  %s49_s1 = sshll.u32 %s110_s16, 4  ;;  %s50_s1 = int_to_ptr.vmem [resolvable:$true] %s49_s1 }
  0x10   :  { %s83_s17 = scalar_lea.vmem %s50_s1, 256  ;;  %p88_p6 = scmp.lt.s32.totalorder %s50_s1, %s50_s1 }
  0x11   :  { %v33_v5 = vunpack.c.0.s8 %v32_v3  ;;  %p84_p5 = scmp.ne.s32.totalorder %s50_s1, %s83_s17  ;;  %p89_p7 = scmp.lt.s32.totalorder %s83_s17, %s83_s17 }
  0x13   :  { %v36_v7 = vsub.s32 %v33_v5, %v35_v6  ;;  %p90_p8 = por %p89_p7, %p88_p6 }
  0x15   :  { %p91_p9 = pnand %p90_p8, %p84_p5 }
  0x8a   :  { %v30_v8 = vpop.permute.xlu0 %29 }
  0x8b   :  { %v37_v11 = vrot.slane %v30_v8, %v36_v7 }
  0x8d   :  { %v39_v12 = vmul.f32 %v37_v11, %v24_v9  ;;  %v40_v13 = vmul.f32 %v37_v11, %v25_v10 }
  0x8f   :  { %41 = vst [vmem:[#allocation5] sm:$0xff] %v39_v12  ;;  %42 = vst [vmem:[#allocation5 + $0x8] sm:$0xff] %v40_v13 }
  0x90   :  { %94 = shalt.err (!%p91_p9)
}
  0x91   :  { %52 = dma.vmem_to_hbm [thread:$0]  %s50_s1, 256, %s137_s2, [#allocation4]  }
  0x92   :  { %105 = dma.done.wait [#allocation4], 256  }
  0x93   :  { %106 = vsyncadd [#allocation4], 4294967040 }
  0x94   :  { %56 = vsyncpa [#allocation3], 1 }
  0x95   :  { %57 = vsyncpa [#allocation4], 1 }

</bundles_post_ra>
